<compile_context>
chip_gen: v7x
topology: tpu7x:2x2x1
jax: 0.10.0
libtpu: 0.0.40
codegen_flags: <defaults>
</compile_context>

<pallas_src>
import functools

import jax
import jax.numpy as jnp
from jax.experimental import pallas as pl
from jax.experimental.pallas import tpu as pltpu

EPS = 1e-6
DROPOUT_P = 0.1


def _hash_u32(x):
    """Murmur-style 32-bit finalizer (pure jnp uint32 ops; VPU-friendly)."""
    x = x ^ jnp.right_shift(x, jnp.uint32(16))
    x = x * jnp.uint32(0x7FEB352D)
    x = x ^ jnp.right_shift(x, jnp.uint32(15))
    x = x * jnp.uint32(0x846CA68B)
    x = x ^ jnp.right_shift(x, jnp.uint32(16))
    return x


def residual_kernel(seed_ref, x_ref, gamma_ref, beta_ref, w_ref, b_ref, o_ref,
                    *, dropout_p):
    x = x_ref[...].astype(jnp.float32)                        # (TM, D)
    tm, d = x.shape

    # ---- LayerNormalization(features): unbiased std, divide by (std + eps) ----
    mean = jnp.mean(x, axis=-1, keepdims=True)
    diff = x - mean
    var = jnp.sum(diff * diff, axis=-1, keepdims=True) * (1.0 / (d - 1))
    std = jnp.sqrt(var)
    y = gamma_ref[...] * (diff / (std + EPS)) + beta_ref[...]  # (1,D) broadcast

    # ---- sublayer(norm(x)): Linear(d_model, d_model) on the MXU ----
    # bf16 inputs + f32 accumulation: native MXU rate, half the weight traffic.
    sub = jnp.dot(y.astype(jnp.bfloat16), w_ref[...],
                  preferred_element_type=jnp.float32)
    sub = sub + b_ref[...]

    # ---- dropout (train mode) -- statically elided when p == 0 ----
    if dropout_p > 0.0:
        row = (jax.lax.broadcasted_iota(jnp.int32, sub.shape, 0)
               + pl.program_id(0) * tm)
        col = jax.lax.broadcasted_iota(jnp.int32, sub.shape, 1)
        ctr = (row * d + col).astype(jnp.uint32)               # global element id
        key = _hash_u32(seed_ref[0].astype(jnp.uint32))
        bits = _hash_u32(ctr ^ key)
        # uniform in [0, 1) from the top 24 bits
        rnd = jnp.right_shift(bits, jnp.uint32(8)).astype(jnp.float32) * (1.0 / (1 << 24))
        keep = rnd >= jnp.float32(dropout_p)
        sub = jnp.where(keep, sub * (1.0 / (1.0 - dropout_p)), 0.0)

    # ---- residual add ----
    o_ref[...] = (x + sub).astype(o_ref.dtype)


def _choose_tile_m(M, D, dtype_bytes=4, vmem_budget=16 * 1024 * 1024):
    """Largest row-tile that divides M, is a multiple of 8 (or == M), and keeps
    double-buffered x+out tiles within a modest VMEM budget."""
    cap = max(8, vmem_budget // (4 * D * dtype_bytes))   # 2 bufs * (x + out)
    cap = min(cap, 1024, M)
    for t in range(cap, 0, -1):
        if M % t == 0 and (t % 8 == 0 or t == M):
            return t
    return M


def residual_connection(x, gamma, beta, w, b, seed, *, dropout_p=DROPOUT_P):
    """x: (B, S, D) float32. Returns (B, S, D)."""
    B, S, D = x.shape
    M = B * S
    tile_m = _choose_tile_m(M, D)
    assert M % tile_m == 0
    x2 = x.reshape(M, D)
    w_bf16 = w.astype(jnp.bfloat16)   # halve HBM/VMEM traffic for the weight

    # NOTE: for very large d_model on v7x (64 MiB VMEM), single-buffer the weight
    # (pipeline_mode=pl.Buffered(1)) or add a K grid axis; at bf16 and the sizes
    # exercised here the full (D, D) weight comfortably fits.
    out = pl.pallas_call(
        functools.partial(residual_kernel, dropout_p=dropout_p),
        out_shape=jax.ShapeDtypeStruct((M, D), x.dtype),
        grid_spec=pltpu.PrefetchScalarGridSpec(
            num_scalar_prefetch=1,                 # seed -> SMEM
            grid=(M // tile_m,),
            in_specs=[
                pl.BlockSpec((tile_m, D), lambda i, seed: (i, 0)),   # x tile
                pl.BlockSpec((1, D),      lambda i, seed: (0, 0)),   # gamma
                pl.BlockSpec((1, D),      lambda i, seed: (0, 0)),   # beta
                pl.BlockSpec((D, D),      lambda i, seed: (0, 0)),   # W (bf16)
                pl.BlockSpec((1, D),      lambda i, seed: (0, 0)),   # b
            ],
            out_specs=pl.BlockSpec((tile_m, D), lambda i, seed: (i, 0)),
        ),
        compiler_params=pltpu.CompilerParams(
            # row axis is fully independent -> shard across v7x's 2 TensorCores
            dimension_semantics=("parallel",),
            vmem_limit_bytes=48 * 1024 * 1024,
        ),
    )(seed, x2, gamma, beta, w_bf16, b)
    return out.reshape(B, S, D)


def _reference_no_dropout(x, gamma, beta, w, b):
    d = x.shape[-1]
    mean = x.mean(-1, keepdims=True)
    diff = x - mean
    var = (diff ** 2).sum(-1, keepdims=True) / (d - 1)
    std = jnp.sqrt(var)
    y = gamma.reshape(-1) * diff / (std + EPS) + beta.reshape(-1)
    sub = jnp.dot(y.astype(jnp.bfloat16), w.astype(jnp.bfloat16),
                  preferred_element_type=jnp.float32) + b.reshape(-1)
    return x + sub


if __name__ == "__main__":
    key = jax.random.PRNGKey(0)
    B, S, D = 2, 16, 128                      # batch, seq, d_model
    kx, kw = jax.random.split(key)

    x = jax.random.normal(kx, (B, S, D), dtype=jnp.float32)

    # LayerNormalization params (alpha=ones, bias=zeros, as nn init)
    gamma = jnp.ones((1, D), jnp.float32)
    beta = jnp.zeros((1, D), jnp.float32)
    # Deterministic sublayer: Linear(D, D)
    w = (jax.random.normal(kw, (D, D), jnp.float32) / jnp.sqrt(D)).astype(jnp.float32)
    b = jnp.zeros((1, D), jnp.float32)

    seed = jnp.array([1234], dtype=jnp.int32)

    # Main run: dropout p=0.1 (train-mode semantics, counter-based hash mask).
    out = residual_connection(x, gamma, beta, w, b, seed, dropout_p=DROPOUT_P)
    jax.block_until_ready(out)
    assert out.shape == (B, S, D) and out.dtype == jnp.float32
    assert bool(jnp.all(jnp.isfinite(out)))

    # Sanity check against pure-JAX reference with dropout disabled (p=0).
    out_p0 = residual_connection(x, gamma, beta, w, b, seed, dropout_p=0.0)
    ref = _reference_no_dropout(x, gamma, beta, w, b)
    assert jnp.allclose(out_p0, ref, atol=1e-2, rtol=1e-2), "mismatch vs reference"

    print("KERNEL_OK")
</pallas_src>

<mosaic_0001>
module attributes {stable_mosaic.version = 11 : i64} {
  func.func @residual_kernel(%arg0: i32, %arg1: memref<1xi32, #tpu.memory_space<smem>>, %arg2: memref<32x128xf32, #tpu.memory_space<vmem>>, %arg3: memref<1x128xf32, #tpu.memory_space<vmem>>, %arg4: memref<1x128xf32, #tpu.memory_space<vmem>>, %arg5: memref<128x128xbf16, #tpu.memory_space<vmem>>, %arg6: memref<1x128xf32, #tpu.memory_space<vmem>>, %arg7: memref<32x128xf32, #tpu.memory_space<vmem>>) attributes {dimension_semantics = [#tpu.dimension_semantics<parallel>], iteration_bounds = array<i64: 1>, scalar_prefetch = 1 : i64, scratch_operands = 0 : i64, tpu.core_type = #tpu.core_type<tc>, window_params = [{transform_indices = @transform_0, window_bounds = array<i64: 32, 128>}, {pipeline_mode = #tpu.pipeline_mode<synchronous>, transform_indices = @transform_1, window_bounds = array<i64: 1, 128>}, {pipeline_mode = #tpu.pipeline_mode<synchronous>, transform_indices = @transform_2, window_bounds = array<i64: 1, 128>}, {pipeline_mode = #tpu.pipeline_mode<synchronous>, transform_indices = @transform_3, window_bounds = array<i64: 128, 128>}, {pipeline_mode = #tpu.pipeline_mode<synchronous>, transform_indices = @transform_4, window_bounds = array<i64: 1, 128>}, {transform_indices = @transform_5, window_bounds = array<i64: 32, 128>}]} {
    %c0 = arith.constant 0 : index
    %c0_0 = arith.constant 0 : index
    %0 = vector.load %arg2[%c0, %c0_0] : memref<32x128xf32, #tpu.memory_space<vmem>>, vector<32x128xf32>
    %cst = arith.constant dense<0.000000e+00> : vector<32xf32>
    %1 = vector.multi_reduction <add>, %0, %cst [1] : vector<32x128xf32> to vector<32xf32>
    %2 = vector.shape_cast %1 : vector<32xf32> to vector<32x1xf32>
    %cst_1 = arith.constant 1.280000e+02 : f32
    %3 = vector.broadcast %cst_1 : f32 to vector<32x1xf32>
    %4 = arith.divf %2, %3 : vector<32x1xf32>
    %5 = vector.broadcast %4 : vector<32x1xf32> to vector<32x128xf32>
    %6 = arith.subf %0, %5 : vector<32x128xf32>
    %7 = arith.mulf %6, %6 : vector<32x128xf32>
    %cst_2 = arith.constant dense<0.000000e+00> : vector<32xf32>
    %8 = vector.multi_reduction <add>, %7, %cst_2 [1] : vector<32x128xf32> to vector<32xf32>
    %9 = vector.shape_cast %8 : vector<32xf32> to vector<32x1xf32>
    %cst_3 = arith.constant 0.00787401571 : f32
    %10 = vector.broadcast %cst_3 : f32 to vector<32x1xf32>
    %11 = arith.mulf %9, %10 : vector<32x1xf32>
    %12 = math.sqrt %11 : vector<32x1xf32>
    %c0_4 = arith.constant 0 : index
    %c0_5 = arith.constant 0 : index
    %13 = vector.load %arg3[%c0_4, %c0_5] : memref<1x128xf32, #tpu.memory_space<vmem>>, vector<1x128xf32>
    %cst_6 = arith.constant 9.99999997E-7 : f32
    %14 = vector.broadcast %cst_6 : f32 to vector<32x1xf32>
    %15 = arith.addf %12, %14 : vector<32x1xf32>
    %16 = vector.broadcast %15 : vector<32x1xf32> to vector<32x128xf32>
    %17 = arith.divf %6, %16 : vector<32x128xf32>
    %18 = vector.broadcast %13 : vector<1x128xf32> to vector<32x128xf32>
    %19 = arith.mulf %18, %17 : vector<32x128xf32>
    %c0_7 = arith.constant 0 : index
    %c0_8 = arith.constant 0 : index
    %20 = vector.load %arg4[%c0_7, %c0_8] : memref<1x128xf32, #tpu.memory_space<vmem>>, vector<1x128xf32>
    %21 = vector.broadcast %20 : vector<1x128xf32> to vector<32x128xf32>
    %22 = arith.addf %19, %21 : vector<32x128xf32>
    %23 = arith.truncf %22 : vector<32x128xf32> to vector<32x128xbf16>
    %c0_9 = arith.constant 0 : index
    %c0_10 = arith.constant 0 : index
    %24 = vector.load %arg5[%c0_9, %c0_10] : memref<128x128xbf16, #tpu.memory_space<vmem>>, vector<128x128xbf16>
    %cst_11 = arith.constant dense<0.000000e+00> : vector<32x128xf32>
    %25 = tpu.matmul %23, %24, %cst_11 {dimension_numbers = #tpu.dot_dimension_numbers<[1], [0], [0], [1], [0, 0, 1, 1], [], []>} : vector<32x128xbf16>, vector<128x128xbf16>, vector<32x128xf32> -> vector<32x128xf32>
    %c0_12 = arith.constant 0 : index
    %c0_13 = arith.constant 0 : index
    %26 = vector.load %arg6[%c0_12, %c0_13] : memref<1x128xf32, #tpu.memory_space<vmem>>, vector<1x128xf32>
    %27 = vector.broadcast %26 : vector<1x128xf32> to vector<32x128xf32>
    %28 = arith.addf %25, %27 : vector<32x128xf32>
    %29 = tpu.iota {dimensions = array<i32: 0>} : vector<32x128xi32>
    %c32_i32 = arith.constant 32 : i32
    %30 = arith.muli %arg0, %c32_i32 : i32
    %31 = vector.broadcast %30 : i32 to vector<32x128xi32>
    %32 = arith.addi %29, %31 : vector<32x128xi32>
    %33 = tpu.iota {dimensions = array<i32: 1>} : vector<32x128xi32>
    %c128_i32 = arith.constant 128 : i32
    %34 = vector.broadcast %c128_i32 : i32 to vector<32x128xi32>
    %35 = arith.muli %32, %34 : vector<32x128xi32>
    %36 = arith.addi %35, %33 : vector<32x128xi32>
    %c0_14 = arith.constant 0 : index
    %37 = memref.load %arg1[%c0_14] : memref<1xi32, #tpu.memory_space<smem>>
    %c16_i32 = arith.constant 16 : i32
    %38 = arith.shrui %37, %c16_i32 : i32
    %39 = arith.xori %37, %38 : i32
    %c2146121005_i32 = arith.constant 2146121005 : i32
    %40 = arith.muli %39, %c2146121005_i32 : i32
    %c15_i32 = arith.constant 15 : i32
    %41 = arith.shrui %40, %c15_i32 : i32
    %42 = arith.xori %40, %41 : i32
    %c-2073254261_i32 = arith.constant -2073254261 : i32
    %43 = arith.muli %42, %c-2073254261_i32 : i32
    %c16_i32_15 = arith.constant 16 : i32
    %44 = arith.shrui %43, %c16_i32_15 : i32
    %45 = arith.xori %43, %44 : i32
    %46 = vector.broadcast %45 : i32 to vector<32x128xi32>
    %47 = arith.xori %36, %46 : vector<32x128xi32>
    %c16_i32_16 = arith.constant 16 : i32
    %48 = vector.broadcast %c16_i32_16 : i32 to vector<32x128xi32>
    %49 = arith.shrui %47, %48 : vector<32x128xi32>
    %50 = arith.xori %47, %49 : vector<32x128xi32>
    %c2146121005_i32_17 = arith.constant 2146121005 : i32
    %51 = vector.broadcast %c2146121005_i32_17 : i32 to vector<32x128xi32>
    %52 = arith.muli %50, %51 : vector<32x128xi32>
    %c15_i32_18 = arith.constant 15 : i32
    %53 = vector.broadcast %c15_i32_18 : i32 to vector<32x128xi32>
    %54 = arith.shrui %52, %53 : vector<32x128xi32>
    %55 = arith.xori %52, %54 : vector<32x128xi32>
    %c-2073254261_i32_19 = arith.constant -2073254261 : i32
    %56 = vector.broadcast %c-2073254261_i32_19 : i32 to vector<32x128xi32>
    %57 = arith.muli %55, %56 : vector<32x128xi32>
    %c16_i32_20 = arith.constant 16 : i32
    %58 = vector.broadcast %c16_i32_20 : i32 to vector<32x128xi32>
    %59 = arith.shrui %57, %58 : vector<32x128xi32>
    %60 = arith.xori %57, %59 : vector<32x128xi32>
    %c8_i32 = arith.constant 8 : i32
    %61 = vector.broadcast %c8_i32 : i32 to vector<32x128xi32>
    %62 = arith.shrui %60, %61 : vector<32x128xi32>
    %63 = arith.uitofp %62 : vector<32x128xi32> to vector<32x128xf32>
    %cst_21 = arith.constant 5.96046448E-8 : f32
    %64 = vector.broadcast %cst_21 : f32 to vector<32x128xf32>
    %65 = arith.mulf %63, %64 : vector<32x128xf32>
    %cst_22 = arith.constant 1.000000e-01 : f32
    %66 = vector.broadcast %cst_22 : f32 to vector<32x128xf32>
    %67 = arith.cmpf oge, %65, %66 : vector<32x128xf32>
    %cst_23 = arith.constant 1.11111116 : f32
    %68 = vector.broadcast %cst_23 : f32 to vector<32x128xf32>
    %69 = arith.mulf %28, %68 : vector<32x128xf32>
    %cst_24 = arith.constant 0.000000e+00 : f32
    %70 = vector.broadcast %cst_24 : f32 to vector<32x128xf32>
    %71 = arith.select %67, %69, %70 : vector<32x128xi1>, vector<32x128xf32>
    %72 = arith.addf %0, %71 : vector<32x128xf32>
    %c0_25 = arith.constant 0 : index
    %c0_26 = arith.constant 0 : index
    %73 = vector.load %arg7[%c0_25, %c0_26] : memref<32x128xf32, #tpu.memory_space<vmem>>, vector<32x128xf32>
    tpu.vector_store %arg7[%c0_25, %c0_26], %72 {strides = array<i32>} : memref<32x128xf32, #tpu.memory_space<vmem>>, vector<32x128xf32>,
    return
  }
  func.func @transform_0(%arg0: i32, %arg1: memref<1xi32, #tpu.memory_space<smem>>) -> (i32, i32) {
    %c0_i32 = arith.constant 0 : i32
    %c0_i32_0 = arith.constant 0 : i32
    return %arg0, %c0_i32 : i32, i32
  }
  func.func @transform_1(%arg0: i32, %arg1: memref<1xi32, #tpu.memory_space<smem>>) -> (i32, i32) {
    %c0_i32 = arith.constant 0 : i32
    %c0_i32_0 = arith.constant 0 : i32
    %c0_i32_1 = arith.constant 0 : i32
    return %c0_i32, %c0_i32_0 : i32, i32
  }
  func.func @transform_2(%arg0: i32, %arg1: memref<1xi32, #tpu.memory_space<smem>>) -> (i32, i32) {
    %c0_i32 = arith.constant 0 : i32
    %c0_i32_0 = arith.constant 0 : i32
    %c0_i32_1 = arith.constant 0 : i32
    return %c0_i32, %c0_i32_0 : i32, i32
  }
  func.func @transform_3(%arg0: i32, %arg1: memref<1xi32, #tpu.memory_space<smem>>) -> (i32, i32) {
    %c0_i32 = arith.constant 0 : i32
    %c0_i32_0 = arith.constant 0 : i32
    %c0_i32_1 = arith.constant 0 : i32
    return %c0_i32, %c0_i32_0 : i32, i32
  }
  func.func @transform_4(%arg0: i32, %arg1: memref<1xi32, #tpu.memory_space<smem>>) -> (i32, i32) {
    %c0_i32 = arith.constant 0 : i32
    %c0_i32_0 = arith.constant 0 : i32
    %c0_i32_1 = arith.constant 0 : i32
    return %c0_i32, %c0_i32_0 : i32, i32
  }
  func.func @transform_5(%arg0: i32, %arg1: memref<1xi32, #tpu.memory_space<smem>>) -> (i32, i32) {
    %c0_i32 = arith.constant 0 : i32
    %c0_i32_0 = arith.constant 0 : i32
    return %arg0, %c0_i32 : i32, i32
  }
}

</mosaic_0001>

<bundles_post_ra>
// kernel: tpu_custom_call.1
= control target key start
LH: loop header
LB: loop body
LE: loop exit
PB: predicated region body
PF: predicated region fallthrough
CT: control target
= control target key end

     0   :  { %12 = vsyncpa [#allocation5], 0  ;;  %s693_s0 = inlined_call_operand.<no memory space> [shape: s32[1], index: 0, kind: input, shape index: {}]   ;;  %s694_s1 = inlined_call_operand.hbm [shape: f32[32,128], index: 1, kind: input, shape index: {}]   ;;  %s695_s2 = inlined_call_operand.vmem [shape: f32[1,128], index: 2, kind: input, shape index: {}]   ;;  %s696_s3 = inlined_call_operand.vmem [shape: f32[1,128], index: 3, kind: input, shape index: {}]   ;;  %s697_s4 = inlined_call_operand.hbm [shape: bf16[128,128], index: 4, kind: input, shape index: {}]   ;;  %s698_s5 = inlined_call_operand.vmem [shape: f32[1,128], index: 5, kind: input, shape index: {}]   ;;  %s699_s6 = inlined_call_operand.hbm [shape: f32[32,128], index: 6, kind: output, shape index: {}]  }
   0x1   :  { %13 = vsyncpa [#allocation8], 0 }
   0x2   :  { %14 = vsyncpa [#allocation6], 0  ;;  %s554_s21 = smov [#allocation4]   ;;  %s482_s25 = scalar_lea.hbm %s694_s1, 512 }
   0x3   :  { %s20_s22 = sshll.u32 %s554_s21, 4  ;;  %p483_p0 = scmp.ne.s32.totalorder %s694_s1, %s482_s25  ;;  %s21_s22 = int_to_ptr.vmem [resolvable:$true] %s20_s22 }
   0x4   :  { %p486_p1 = scmp.lt.u32.totalorder %s482_s25, %s694_s1 }
   0x6   :  { %p488_p2 = pnand %p486_p1, %p483_p0 }
   0x8   :  { %491 = shalt.err (!%p488_p2)
}
   0x9   :  { %s492_s30 = scalar_lea.vmem %s21_s22, 512  ;;  %p497_p4 = scmp.lt.s32.totalorder %s21_s22, %s21_s22 }
   0xa   :  { %p493_p3 = scmp.ne.s32.totalorder %s21_s22, %s492_s30  ;;  %p498_p5 = scmp.lt.s32.totalorder %s492_s30, %s492_s30 }
   0xc   :  { %p499_p6 = por %p498_p5, %p497_p4 }
   0xe   :  { %p500_p7 = pnand %p499_p6, %p493_p3 }
  0x10   :  { %503 = shalt.err (!%p500_p7)
}
  0x11   :  { %s555_s7 = smov 128   ;;  %s556_s8 = smov 8  }
  0x12   :  { %26 = dma.hbm_to_vmem [thread:$0]  %s694_s1, 512, %s21_s22, [#allocation5], %s555_s7, %s555_s7, %s556_s8  }
  0x13   :  { %s557_s11 = smov [#allocation7]   ;;  %s504_s15 = scalar_lea.hbm %s697_s4, 1024 }
  0x14   :  { %s36_s12 = sshll.u32 %s557_s11, 4  ;;  %p505_p8 = scmp.ne.s32.totalorder %s697_s4, %s504_s15  ;;  %s37_s12 = int_to_ptr.vmem [resolvable:$true] %s36_s12 }
  0x15   :  { %p508_p9 = scmp.lt.u32.totalorder %s504_s15, %s697_s4 }
  0x17   :  { %p510_p10 = pnand %p508_p9, %p505_p8 }
  0x19   :  { %513 = shalt.err (!%p510_p10)
}
  0x1a   :  { %s514_s20 = scalar_lea.vmem %s37_s12, 1024  ;;  %p519_p12 = scmp.lt.s32.totalorder %s37_s12, %s37_s12 }
  0x1b   :  { %p515_p11 = scmp.ne.s32.totalorder %s37_s12, %s514_s20  ;;  %p520_p13 = scmp.lt.s32.totalorder %s514_s20, %s514_s20 }
  0x1d   :  { %p521_p0 = por %p520_p13, %p519_p12 }
  0x1f   :  { %p522_p1 = pnand %p521_p0, %p515_p11 }
  0x21   :  { %525 = shalt.err (!%p522_p1)
}
  0x22   :  { %s558_s1 = smov 64   ;;  %s559_s21 = smov 4  }
  0x23   :  { %42 = dma.hbm_to_vmem [thread:$0]  %s697_s4, 1024, %s37_s12, [#allocation8], %s558_s1, %s558_s1, %s559_s21  }
  0x24   :  { %548 = dma.done.wait [#allocation5], 512  }
  0x25   :  { %549 = vsyncadd [#allocation5], 4294966784 }
  0x26   :  { %550 = dma.done.wait [#allocation8], 1024  }
  0x27   :  { %551 = vsyncadd [#allocation8], 4294966272  ;;  %v623_v0 = vld [vmem:[#allocation4] sm:$0xff]  ;;  %v625_v1 = vld [vmem:[#allocation4 + $0x10] sm:$0xff] }
  0x28   :  { %v627_v2 = vld [vmem:[#allocation4 + $0x8] sm:$0xff]  ;;  %56 = vadd.xlane.f32.xlu0 %v623_v0  ;;  %60 = vadd.xlane.f32.xlu1 %v625_v1  ;;  %v631_v3 = vld [vmem:[#allocation4 + $0x18] sm:$0xff]  ;;  %v458_v20 = vld [vmem:[#allocation7] sm:$0xff]  }
  0x29   :  { %431 = vmatprep.subr.bf16.mxu0 %v458_v20  ;;  %v459_v21 = vld [vmem:[#allocation7 + $0x8] sm:$0xff]   ;;  %v460_v22 = vld [vmem:[#allocation7 + $0x10] sm:$0xff]   ;;  %v461_v23 = vld [vmem:[#allocation7 + $0x18] sm:$0xff]  }
  0x2a   :  { %432 = vmatpush3.bf16.msra.mxu0 %v458_v20  ;;  %v462_v24 = vld [vmem:[#allocation7 + $0x20] sm:$0xff]   ;;  %v463_v25 = vld [vmem:[#allocation7 + $0x28] sm:$0xff]   ;;  %v464_v26 = vld [vmem:[#allocation7 + $0x30] sm:$0xff]  }
  0x2b   :  { %433 = vmatprep.subr.bf16.mxu0 %v459_v21  ;;  %v465_v27 = vld [vmem:[#allocation7 + $0x38] sm:$0xff]   ;;  %v410_v62 = vld [vmem:[%s695_s2] ss:$0 sm:$0xff] }
  0x2c   :  { %58 = vadd.xlane.f32.xlu0 %v627_v2  ;;  %62 = vadd.xlane.f32.xlu1 %v631_v3 }
  0x2e   :  { %434 = vmatpush3.bf16.msra.mxu0 %v459_v21 }
  0x2f   :  { %435 = vmatprep.subr.bf16.mxu0 %v460_v22 }
  0x32   :  { %436 = vmatpush3.bf16.msra.mxu0 %v460_v22 }
  0x33   :  { %437 = vmatprep.subr.bf16.mxu0 %v461_v23 }
  0x36   :  { %438 = vmatpush3.bf16.msra.mxu0 %v461_v23 }
  0x37   :  { %439 = vmatprep.subr.bf16.mxu0 %v462_v24 }
  0x3a   :  { %440 = vmatpush3.bf16.msra.mxu0 %v462_v24 }
  0x3b   :  { %441 = vmatprep.subr.bf16.mxu0 %v463_v25 }
  0x3e   :  { %442 = vmatpush3.bf16.msra.mxu0 %v463_v25 }
  0x3f   :  { %443 = vmatprep.subr.bf16.mxu0 %v464_v26 }
  0x42   :  { %444 = vmatpush3.bf16.msra.mxu0 %v464_v26 }
  0x43   :  { %445 = vmatprep.subr.bf16.mxu0 %v465_v27 }
  0x46   :  { %446 = vmatpush3.bf16.msra.mxu0 %v465_v27 }
  0xb5   :  { %v57_v4 = vpop.xlane.xlu0 %56  ;;  %v61_v5 = vpop.xlane.xlu1 %60 }
  0xb6   :  { %v65_v6 = vmul.f32 0.0078125, %v57_v4  ;;  %v67_v7 = vmul.f32 0.0078125, %v61_v5 }
  0xb8   :  { %v636_v8 = vsub.f32 %v623_v0, %v65_v6  ;;  %v639_v9 = vsub.f32 %v625_v1, %v67_v7  ;;  %v411_v7 = vld [vmem:[%s696_s3] ss:$0 sm:$0xff]  ;;  %s295_s3 = sshrl.u32 %s693_s0, 16 }
  0xb9   :  { %v59_v10 = vpop.xlane.xlu0 %58  ;;  %v63_v11 = vpop.xlane.xlu1 %62  ;;  %s296_s30 = sxor.u32 %s295_s3, %s693_s0 }
  0xba   :  { %v66_v12 = vmul.f32 0.0078125, %v59_v10  ;;  %v73_v13 = vmul.f32 %v636_v8, %v636_v8  ;;  %v68_v14 = vmul.f32 0.0078125, %v63_v11  ;;  %v75_v17 = vmul.f32 %v639_v9, %v639_v9  ;;  %s297_s9 = smul.u32 2146121005, %s296_s30 }
  0xbc   :  { %v644_v15 = vsub.f32 %v627_v2, %v66_v12  ;;  %77 = vadd.xlane.f32.xlu0 %v73_v13  ;;  %v647_v16 = vsub.f32 %v631_v3, %v68_v14  ;;  %s298_s10 = sshrl.u32 %s297_s9, 15 }
  0xbd   :  { %s299_s11 = sxor.u32 %s298_s10, %s297_s9 }
  0xbe   :  { %v74_v18 = vmul.f32 %v644_v15, %v644_v15  ;;  %v76_v19 = vmul.f32 %v647_v16, %v647_v16  ;;  %s300_s12 = smul.u32 2221713035, %s299_s11 }
  0xc0   :  { %81 = vadd.xlane.f32.xlu0 %v75_v17  ;;  %79 = vadd.xlane.f32.xlu1 %v74_v18  ;;  %s301_s13 = sshrl.u32 %s300_s12, 16 }
  0xc1   :  { %s302_s14 = sxor.u32 %s301_s13, %s300_s12 }
  0xc4   :  { %83 = vadd.xlane.f32.xlu1 %v76_v19 }
 0x149   :  { %v78_v28 = vpop.xlane.xlu0 %77 }
 0x14a   :  { %v85_v29 = vmul.f32 0.007874016, %v78_v28 }
 0x14c   :  { %466 = vrsqrt.f32 %v85_v29  ;;  %vm91_vm0 = vcmp.eq.f32.partialorder %v85_v29, inf  ;;  %v94_v38 = vand.u32 2147483648, %v85_v29  ;;  %vm93_vm1 = vcmp.eq.f32.partialorder %v85_v29, 0.0 }
 0x14d   :  { %v80_v30 = vpop.xlane.xlu1 %79  ;;  %v82_v31 = vpop.xlane.xlu0 %81 }
 0x14e   :  { %v86_v32 = vmul.f32 0.007874016, %v80_v30  ;;  %v87_v33 = vmul.f32 0.007874016, %v82_v31  ;;  %v303_v31 = vstv %s302_s14 }
 0x150   :  { %468 = vrsqrt.f32 %v86_v32  ;;  %vm98_vm2 = vcmp.eq.f32.partialorder %v86_v32, inf  ;;  %vm100_vm3 = vcmp.eq.f32.partialorder %v86_v32, 0.0  ;;  %v101_v45 = vand.u32 2147483648, %v86_v32 }
 0x151   :  { %470 = vrsqrt.f32 %v87_v33  ;;  %v84_v34 = vpop.xlane.xlu1 %83  ;;  %vm105_vm4 = vcmp.eq.f32.partialorder %v87_v33, inf  ;;  %v108_v48 = vand.u32 2147483648, %v87_v33  ;;  %vm107_vm5 = vcmp.eq.f32.partialorder %v87_v33, 0.0 }
 0x152   :  { %v88_v35 = vmul.f32 0.007874016, %v84_v34 }
 0x154   :  { %472 = vrsqrt.f32 %v88_v35  ;;  %vm112_vm6 = vcmp.eq.f32.partialorder %v88_v35, inf  ;;  %v115_v56 = vand.u32 2147483648, %v88_v35  ;;  %vm114_vm7 = vcmp.eq.f32.partialorder %v88_v35, 0.0 }
 0x156   :  { %v467_v36 = vpop.eup %466 }
 0x157   :  { %v90_v37 = vmul.f32 %v467_v36, %v85_v29 }
 0x159   :  { %v92_v39 = vsel %vm91_vm0, %v85_v29, %v90_v37 }
 0x15a   :  { %v469_v40 = vpop.eup %468  ;;  %v95_v41 = vsel %vm93_vm1, %v94_v38, %v92_v39 }
 0x15b   :  { %v471_v42 = vpop.eup %470  ;;  %v97_v43 = vmul.f32 %v469_v40, %v86_v32  ;;  %v118_v44 = vadd.f32 1e-06, %v95_v41 }
 0x15c   :  { %v104_v46 = vmul.f32 %v471_v42, %v87_v33 }
 0x15d   :  { %v99_v47 = vsel %vm98_vm2, %v86_v32, %v97_v43  ;;  %474 = vrcp.f32 %v118_v44 }
 0x15e   :  { %v473_v49 = vpop.eup %472  ;;  %v106_v50 = vsel %vm105_vm4, %v87_v33, %v104_v46  ;;  %v102_v51 = vsel %vm100_vm3, %v101_v45, %v99_v47 }
 0x15f   :  { %v109_v52 = vsel %vm107_vm5, %v108_v48, %v106_v50  ;;  %v111_v53 = vmul.f32 %v473_v49, %v88_v35  ;;  %v119_v54 = vadd.f32 1e-06, %v102_v51 }
 0x160   :  { %v120_v55 = vadd.f32 1e-06, %v109_v52 }
 0x161   :  { %v113_v57 = vsel %vm112_vm6, %v88_v35, %v111_v53  ;;  %476 = vrcp.f32 %v119_v54 }
 0x162   :  { %478 = vrcp.f32 %v120_v55  ;;  %v116_v58 = vsel %vm114_vm7, %v115_v56, %v113_v57 }
 0x163   :  { %v121_v59 = vadd.f32 1e-06, %v116_v58 }
 0x165   :  { %480 = vrcp.f32 %v121_v59 }
 0x167   :  { %v475_v60 = vpop.eup %474 }
 0x168   :  { %v123_v61 = vmul.f32 %v475_v60, %v636_v8 }
 0x16a   :  { %v136_v6 = vmul.f32 %v410_v62, %v123_v61 }
 0x16b   :  { %v477_v63 = vpop.eup %476 }
 0x16c   :  { %v479_v4 = vpop.eup %478  ;;  %v125_v5 = vmul.f32 %v477_v63, %v644_v15  ;;  %v147_v13 = vadd.f32 %v411_v7, %v136_v6 }
 0x16d   :  { %v127_v10 = vmul.f32 %v479_v4, %v639_v9  ;;  %v273_v9 = vlaneseq }
 0x16e   :  { %v137_v11 = vmul.f32 %v410_v62, %v125_v5 }
 0x16f   :  { %v481_v12 = vpop.eup %480  ;;  %v138_v17 = vmul.f32 %v410_v62, %v127_v10  ;;  %v285_v25 = vand.u32 127, %v273_v9 }
 0x170   :  { %v148_v14 = vadd.f32 %v411_v7, %v137_v11  ;;  %v129_v8 = vmul.f32 %v481_v12, %v647_v16  ;;  %v274_v16 = vshrl.u32 %v273_v9, 7 }
 0x171   :  { %v149_v20 = vadd.f32 %v411_v7, %v138_v17 }
 0x172   :  { %v151_v18 = vpack.c.bf16 %v148_v14, %v147_v13  ;;  %v139_v19 = vmul.f32 %v410_v62, %v129_v8  ;;  %v276_v22 = vadd.s32 16, %v274_v16  ;;  %v277_v23 = vadd.s32 24, %v274_v16 }
 0x173   :  { %v275_v24 = vadd.s32 8, %v274_v16  ;;  %v286_v27 = vmul.u32 128, %v274_v16 }
 0x174   :  { %447 = vmatprep.mubr.bf16.mxu0 %v151_v18  ;;  %v150_v21 = vadd.f32 %v411_v7, %v139_v19  ;;  %v288_v26 = vmul.u32 128, %v276_v22  ;;  %v289_v28 = vmul.u32 128, %v277_v23 }
 0x175   :  { %v287_v29 = vmul.u32 128, %v275_v24  ;;  %v290_v32 = vadd.s32 %v286_v27, %v285_v25 }
 0x176   :  { %v152_v15 = vpack.c.bf16 %v150_v21, %v149_v20  ;;  %v292_v30 = vadd.s32 %v288_v26, %v285_v25  ;;  %v293_v33 = vadd.s32 %v289_v28, %v285_v25 }
 0x177   :  { %v291_v34 = vadd.s32 %v287_v29, %v285_v25  ;;  %v304_v36 = vxor.u32 %v303_v31, %v290_v32 }
 0x178   :  { %448 = vmatmul.mubr.bf16.vlgmr.msra.gmra.mrb[0].mxu0 %v152_v15  ;;  %v306_v35 = vxor.u32 %v303_v31, %v292_v30  ;;  %v307_v37 = vxor.u32 %v303_v31, %v293_v33 }
 0x179   :  { %v305_v38 = vxor.u32 %v303_v31, %v291_v34  ;;  %v308_v40 = vshrl.u32 %v304_v36, 16 }
 0x17a   :  { %v310_v39 = vshrl.u32 %v306_v35, 16  ;;  %v311_v41 = vshrl.u32 %v307_v37, 16 }
 0x17b   :  { %v309_v42 = vshrl.u32 %v305_v38, 16  ;;  %v312_v44 = vxor.u32 %v308_v40, %v304_v36 }
 0x17c   :  { %v314_v43 = vxor.u32 %v310_v39, %v306_v35  ;;  %v315_v45 = vxor.u32 %v311_v41, %v307_v37  ;;  %v412_v39 = vld [vmem:[%s698_s5] ss:$0 sm:$0xff]  ;;  %s560_s5 = smov [#allocation9]  }
 0x17d   :  { %v313_v46 = vxor.u32 %v309_v42, %v305_v38  ;;  %v316_v48 = vmul.u32 2146121005, %v312_v44  ;;  %s397_s16 = sshll.u32 %s560_s5, 4  ;;  %s398_s16 = int_to_ptr.vmem [resolvable:$true] %s397_s16 }
 0x17e   :  { %v318_v47 = vmul.u32 2146121005, %v314_v43  ;;  %v319_v49 = vmul.u32 2146121005, %v315_v45  ;;  %s526_s17 = scalar_lea.vmem %s398_s16, 512  ;;  %p531_p3 = scmp.lt.s32.totalorder %s398_s16, %s398_s16 }
 0x17f   :  { %v317_v50 = vmul.u32 2146121005, %v313_v46  ;;  %v320_v52 = vshrl.u32 %v316_v48, 15  ;;  %p527_p2 = scmp.ne.s32.totalorder %s398_s16, %s526_s17  ;;  %p532_p4 = scmp.lt.s32.totalorder %s526_s17, %s526_s17 }
 0x180   :  { %v322_v51 = vshrl.u32 %v318_v47, 15  ;;  %v323_v53 = vshrl.u32 %v319_v49, 15 }
 0x181   :  { %v321_v54 = vshrl.u32 %v317_v50, 15  ;;  %v324_v56 = vxor.u32 %v320_v52, %v316_v48  ;;  %p533_p5 = por %p532_p4, %p531_p3 }
 0x182   :  { %v326_v55 = vxor.u32 %v322_v51, %v318_v47  ;;  %v327_v57 = vxor.u32 %v323_v53, %v319_v49 }
 0x183   :  { %v325_v58 = vxor.u32 %v321_v54, %v317_v50  ;;  %v328_v60 = vmul.u32 2221713035, %v324_v56  ;;  %p534_p6 = pnand %p533_p5, %p527_p2 }
 0x184   :  { %v330_v59 = vmul.u32 2221713035, %v326_v55  ;;  %v331_v61 = vmul.u32 2221713035, %v327_v57 }
 0x185   :  { %v329_v62 = vmul.u32 2221713035, %v325_v58  ;;  %v332_v4 = vshrl.u32 %v328_v60, 16 }
 0x186   :  { %v334_v63 = vshrl.u32 %v330_v59, 16  ;;  %v335_v5 = vshrl.u32 %v331_v61, 16 }
 0x187   :  { %v333_v6 = vshrl.u32 %v329_v62, 16  ;;  %v336_v10 = vxor.u32 %v332_v4, %v328_v60 }
 0x188   :  { %v338_v7 = vxor.u32 %v334_v63, %v330_v59  ;;  %v339_v11 = vxor.u32 %v335_v5, %v331_v61 }
 0x189   :  { %v337_v12 = vxor.u32 %v333_v6, %v329_v62  ;;  %v340_v14 = vshrl.u32 %v336_v10, 8 }
 0x18a   :  { %v342_v13 = vshrl.u32 %v338_v7, 8  ;;  %v343_v8 = vshrl.u32 %v339_v11, 8 }
 0x18b   :  { %v341_v17 = vshrl.u32 %v337_v12, 8  ;;  %v344_v19 = vshrl.u32 %v340_v14, 16  ;;  %v345_v16 = vand.u32 65535, %v340_v14 }
 0x18c   :  { %v356_v18 = vshrl.u32 %v342_v13, 16  ;;  %v362_v20 = vshrl.u32 %v343_v8, 16  ;;  %v357_v15 = vand.u32 65535, %v342_v13  ;;  %v363_v23 = vand.u32 65535, %v343_v8 }
 0x18d   :  { %v350_v21 = vshrl.u32 %v341_v17, 16  ;;  %v346_v22 = vcvt.s32.f32 %v344_v19  ;;  %v351_v25 = vand.u32 65535, %v341_v17  ;;  %v348_v30 = vcvt.s32.f32 %v345_v16 }
 0x18e   :  { %v358_v9 = vcvt.s32.f32 %v356_v18  ;;  %v364_v24 = vcvt.s32.f32 %v362_v20  ;;  %v360_v28 = vcvt.s32.f32 %v357_v15  ;;  %v366_v32 = vcvt.s32.f32 %v363_v23 }
 0x18f   :  { %v352_v26 = vcvt.s32.f32 %v350_v21  ;;  %v347_v29 = vmul.f32 65536.0, %v346_v22  ;;  %v354_v34 = vcvt.s32.f32 %v351_v25 }
 0x190   :  { %v359_v27 = vmul.f32 65536.0, %v358_v9  ;;  %v365_v31 = vmul.f32 65536.0, %v364_v24 }
 0x191   :  { %v353_v33 = vmul.f32 65536.0, %v352_v26  ;;  %v349_v36 = vadd.f32 %v348_v30, %v347_v29 }
 0x192   :  { %v361_v35 = vadd.f32 %v360_v28, %v359_v27  ;;  %v367_v37 = vadd.f32 %v366_v32, %v365_v31 }
 0x193   :  { %v355_v38 = vadd.f32 %v354_v34, %v353_v33  ;;  %v368_v41 = vmul.f32 5.9604645e-08, %v349_v36 }
 0x194   :  { %v370_v40 = vmul.f32 5.9604645e-08, %v361_v35  ;;  %v371_v43 = vmul.f32 5.9604645e-08, %v367_v37 }
 0x195   :  { %v369_v46 = vmul.f32 5.9604645e-08, %v355_v38  ;;  %vm372_vm9 = vcmp.ge.f32.partialorder %v368_v41, 0.1 }
 0x196   :  { %vm374_vm8 = vcmp.ge.f32.partialorder %v370_v40, 0.1  ;;  %vm375_vm10 = vcmp.ge.f32.partialorder %v371_v43, 0.1 }
 0x197   :  { %vm373_vm11 = vcmp.ge.f32.partialorder %v369_v46, 0.1 }
 0x24b   :  { %v449_v42 = vpop.f32.mrb[0].mxu0 }
 0x24c   :  { %v267_v44 = vadd.f32 %v449_v42, %v412_v39  ;;  %v258_v45 = vpop.f32.mrb[1].mxu0 }
 0x24d   :  { %v259_v47 = vadd.f32 %v412_v39, %v258_v45  ;;  %v450_v48 = vpop.f32.mrb[2].mxu0 }
 0x24e   :  { %v378_v49 = vmul.f32 1.1111112, %v267_v44  ;;  %v270_v50 = vadd.f32 %v450_v48, %v412_v39  ;;  %v261_v51 = vpop.f32.mrb[3].mxu0 }
 0x24f   :  { %v376_v52 = vmul.f32 1.1111112, %v259_v47  ;;  %v262_v53 = vadd.f32 %v412_v39, %v261_v51 }
 0x250   :  { %v382_v54 = vsel %vm374_vm8, %v378_v49, 0.0  ;;  %v379_v55 = vmul.f32 1.1111112, %v270_v50 }
 0x251   :  { %v386_v56 = vadd.f32 %v382_v54, %v625_v1  ;;  %v380_v57 = vsel %vm372_vm9, %v376_v52, 0.0  ;;  %v377_v58 = vmul.f32 1.1111112, %v262_v53 }
 0x252   :  { %v384_v59 = vadd.f32 %v380_v57, %v623_v0  ;;  %v383_v60 = vsel %vm375_vm10, %v379_v55, 0.0 }
 0x253   :  { %390 = vst [vmem:[#allocation9 + $0x10] sm:$0xff] %v386_v56  ;;  %v387_v61 = vadd.f32 %v383_v60, %v631_v3  ;;  %v381_v62 = vsel %vm373_vm11, %v377_v58, 0.0 }
 0x254   :  { %388 = vst [vmem:[#allocation9] sm:$0xff] %v384_v59  ;;  %v385_v63 = vadd.f32 %v381_v62, %v627_v2 }
 0x255   :  { %391 = vst [vmem:[#allocation9 + $0x18] sm:$0xff] %v387_v61 }
 0x256   :  { %389 = vst [vmem:[#allocation9 + $0x8] sm:$0xff] %v385_v63 }
 0x257   :  { %537 = shalt.err (!%p534_p6)
}
 0x258   :  { %s538_s20 = scalar_lea.hbm %s699_s6, 512 }
 0x259   :  { %p539_p7 = scmp.ne.s32.totalorder %s699_s6, %s538_s20  ;;  %p542_p8 = scmp.lt.u32.totalorder %s538_s20, %s699_s6 }
 0x25b   :  { %p544_p9 = pnand %p542_p8, %p539_p7 }
 0x25d   :  { %547 = shalt.err (!%p544_p9)
}
 0x25e   :  { %403 = dma.vmem_to_hbm [thread:$0]  %s398_s16, 512, %s699_s6, [#allocation6], %s555_s7, %s555_s7, %s556_s8  }
 0x25f   :  { %552 = dma.done.wait [#allocation6], 512  }
 0x260   :  { %553 = vsyncadd [#allocation6], 4294966784 }
 0x261   :  { %407 = vsyncpa [#allocation5], 1 }
 0x262   :  { %408 = vsyncpa [#allocation8], 1 }
 0x263   :  { %409 = vsyncpa [#allocation6], 1 }

</bundles_post_ra>
